<compile_context>
chip_gen: v7x
topology: tpu7x:2x2x1
jax: 0.10.0
libtpu: 0.0.40
codegen_flags: <defaults>
</compile_context>

<pallas_src>
import functools

import jax
import jax.numpy as jnp
from jax.experimental import pallas as pl
from jax.experimental.pallas import tpu as pltpu

HIDDEN = 256
OUT_PAD = 128  # lane-dense padding of the 2-wide Q-value head


# --------------------------------------------------------------------------- #
# Kernel
# --------------------------------------------------------------------------- #
def qnet_kernel(x_ref, w1_ref, b1_ref, w2_ref, b2_ref, w3_ref, b3_ref, o_ref):
    x = x_ref[...]          # (TB, 4)  f32
    w1 = w1_ref[...]        # (4, 256) f32

    # Layer 1: 4-term VPU broadcast-FMA + ReLU (keeps the MXU free).
    # (Possible v6e/v7x-only tweak: do this in bf16 to drop the pack before
    #  layer 2 -- skipped: marginal, and would regress v5e's f32-only VPU.)
    h1 = (x[:, 0:1] * w1[0:1, :]
          + x[:, 1:2] * w1[1:2, :]
          + x[:, 2:3] * w1[2:3, :]
          + x[:, 3:4] * w1[3:4, :]
          + b1_ref[...])
    h1 = jnp.maximum(h1, 0.0)                                   # (TB, 256) f32

    # Layer 2: bf16 x bf16 -> f32 accumulate on the MXU, + bias, ReLU.
    h2 = jnp.dot(h1.astype(jnp.bfloat16), w2_ref[...],
                 preferred_element_type=jnp.float32)
    h2 = jnp.maximum(h2 + b2_ref[...], 0.0)                     # (TB, 256) f32

    # Layer 3: padded to 128 output lanes (cols 2..127 are zero weights).
    h3 = jnp.dot(h2.astype(jnp.bfloat16), w3_ref[...],
                 preferred_element_type=jnp.float32)
    o_ref[...] = (h3 + b3_ref[...]).astype(o_ref.dtype)         # (TB, 128)


# --------------------------------------------------------------------------- #
# Tiling helpers
# --------------------------------------------------------------------------- #
def _round_up(n, m):
    return ((n + m - 1) // m) * m


def _tensorcores_per_chip():
    """Best-effort TensorCore count per chip (v7x/v4 megacore -> 2, else 1)."""
    try:
        kind = jax.devices()[0].device_kind.lower()
    except Exception:
        return 1
    return 2 if ("v7" in kind or "v4" in kind) else 1


def _pick_batch_tile(B, block_b, num_cores):
    """Static (trace-time) batch-tile choice.

    * Larger tiles for big batches amortize the ~0.35 us per-grid-step cost.
    * Never exceed ceil(B/num_cores) (rounded to 8 sublanes), so the
      ("parallel",) grid axis has >= num_cores steps whenever B allows and
      both v7x TensorCores get work at common batch sizes like 128.
    """
    if block_b is None:
        block_b = 512 if B >= 1024 else (256 if B >= 256 else 128)
    b8 = _round_up(B, 8)
    per_core = _round_up(-(-b8 // max(num_cores, 1)), 8)
    tb = max(8, min(block_b, per_core))
    bp = _round_up(b8, tb)
    return tb, bp


# --------------------------------------------------------------------------- #
# Pure-JAX forward (acting-path bypass AND numerical reference for tests).
# Matches the kernel's numerics: f32 broadcast-FMA layer 1, bf16 weights with
# f32 accumulation for layers 2/3.
# --------------------------------------------------------------------------- #
def qnet_xla_forward(x, p):
    w1 = p["w1"]
    h1 = (x[:, 0:1] * w1[0:1, :] + x[:, 1:2] * w1[1:2, :]
          + x[:, 2:3] * w1[2:3, :] + x[:, 3:4] * w1[3:4, :] + p["b1"])
    h1 = jnp.maximum(h1, 0.0)
    h2 = jnp.dot(h1.astype(jnp.bfloat16), p["w2"],
                 preferred_element_type=jnp.float32) + p["b2"]
    h2 = jnp.maximum(h2, 0.0)
    h3 = jnp.dot(h2.astype(jnp.bfloat16), p["w3p"],
                 preferred_element_type=jnp.float32) + p["b3p"]
    return h3[:, :2]


# --------------------------------------------------------------------------- #
# Pallas wrapper
# --------------------------------------------------------------------------- #
@functools.partial(
    jax.jit,
    static_argnames=("block_b", "num_cores", "single_buffer_weights",
                     "min_pallas_batch"))
def qnetwork_forward(x, params, *, block_b=None, num_cores=None,
                     single_buffer_weights=True, min_pallas_batch=8):
    """x: (B, 4) float32. params: dict from init_params. Returns (B, 2) f32."""
    w1, b1 = params["w1"], params["b1"]
    w2, b2 = params["w2"], params["b2"]
    w3p, b3p = params["w3p"], params["b3p"]

    B = x.shape[0]
    if B < min_pallas_batch:
        # Acting path (B ~ 1): pallas_call launch + ~200 KB weight DMA per call
        # is pure fixed overhead with zero pipelining benefit -> fused XLA.
        return qnet_xla_forward(x, params)

    if num_cores is None:
        num_cores = _tensorcores_per_chip()
    TB, Bp = _pick_batch_tile(B, block_b, num_cores)
    if Bp != B:
        x = jnp.pad(x, ((0, Bp - B), (0, 0)))
    grid = (Bp // TB,)

    # Weights/biases: constant index_map -> fetched once, VMEM-resident.
    # Buffered(1) drops the useless second buffer + prefetch bookkeeping.
    if single_buffer_weights:
        resident = lambda a: pl.BlockSpec(a.shape, lambda i: (0,) * a.ndim,
                                          pipeline_mode=pl.Buffered(1))
    else:
        resident = lambda a: pl.BlockSpec(a.shape, lambda i: (0,) * a.ndim)

    flops = 2 * Bp * (4 * HIDDEN + HIDDEN * HIDDEN + HIDDEN * OUT_PAD)
    bytes_accessed = (Bp * 4 * 4 + w1.size * 4 + b1.size * 4
                      + w2.size * 2 + b2.size * 4
                      + w3p.size * 2 + b3p.size * 4
                      + Bp * OUT_PAD * 4)

    out_padded = pl.pallas_call(
        qnet_kernel,
        out_shape=jax.ShapeDtypeStruct((Bp, OUT_PAD), jnp.float32),
        grid=grid,
        in_specs=[
            pl.BlockSpec((TB, 4), lambda i: (i, 0)),   # x: tiled over batch
            resident(w1), resident(b1),                # weights stay resident
            resident(w2), resident(b2),
            resident(w3p), resident(b3p),
        ],
        out_specs=pl.BlockSpec((TB, OUT_PAD), lambda i: (i, 0)),
        compiler_params=pltpu.CompilerParams(
            dimension_semantics=("parallel",)),
        cost_estimate=pl.CostEstimate(
            flops=flops, transcendentals=0, bytes_accessed=bytes_accessed),
    )(x, w1, b1, w2, b2, w3p, b3p)

    # TODO(synk): at replay-buffer scale (B >= ~4K) the padded f32 head write
    # (512 B/row vs 8 B useful) plus this slice's re-read become the HBM
    # roofline; fuse the Q-value consumer (argmax / TD target) onto
    # `out_padded` inside one jit instead of materializing (B, 2).
    return out_padded[:B, :2]


# --------------------------------------------------------------------------- #
# Params
# --------------------------------------------------------------------------- #
def init_params(key):
    """Deterministic init (uniform, fan-in scaled like PyTorch default).

    Kernel-ready layout: w1 f32 (4,256); w2 bf16 (256,256);
    w3p bf16 (256,128) zero-padded beyond column 2; biases f32 rows
    (b3p zero-padded to 128 lanes).
    """
    ks = jax.random.split(key, 6)

    def linear(kw, kb, fan_in, fan_out):
        bound = 1.0 / (fan_in ** 0.5)
        w = jax.random.uniform(kw, (fan_in, fan_out), jnp.float32, -bound, bound)
        b = jax.random.uniform(kb, (1, fan_out), jnp.float32, -bound, bound)
        return w, b

    w1, b1 = linear(ks[0], ks[1], 4, HIDDEN)
    w2, b2 = linear(ks[2], ks[3], HIDDEN, HIDDEN)
    w3, b3 = linear(ks[4], ks[5], HIDDEN, 2)

    w3p = jnp.zeros((HIDDEN, OUT_PAD), jnp.float32).at[:, :2].set(w3)
    b3p = jnp.zeros((1, OUT_PAD), jnp.float32).at[:, :2].set(b3)

    return dict(
        w1=w1, b1=b1,
        w2=w2.astype(jnp.bfloat16), b2=b2,
        w3p=w3p.astype(jnp.bfloat16), b3p=b3p,
    )


# --------------------------------------------------------------------------- #
# Test harness
# --------------------------------------------------------------------------- #
_SINGLE_BUFFER_OK = True


def _run_forward(x, params):
    """Run the Pallas forward; if this Mosaic build rejects single-buffered
    resident weights (pl.Buffered(1)), fall back to the default pipeline
    (identical semantics, just keeps the double buffer)."""
    global _SINGLE_BUFFER_OK
    if _SINGLE_BUFFER_OK:
        try:
            return jax.block_until_ready(
                qnetwork_forward(x, params, single_buffer_weights=True))
        except Exception:
            _SINGLE_BUFFER_OK = False
    return jax.block_until_ready(
        qnetwork_forward(x, params, single_buffer_weights=False))


if __name__ == "__main__":
    key = jax.random.PRNGKey(0)
    kx, kp = jax.random.split(key)
    params = init_params(kp)

    # B=8   -> Pallas, single grid step (small tile).
    # B=300 -> Pallas, multi-step batch grid + row padding (exercises tiling).
    # B=1   -> acting-path XLA bypass.
    for B in (8, 300, 1):
        xb = jax.random.normal(jax.random.fold_in(kx, B), (B, 4), jnp.float32)
        out = _run_forward(xb, params)
        ref = qnet_xla_forward(xb, params)
        assert out.shape == (B, 2), f"bad output shape at B={B}: {out.shape}"
        assert jnp.allclose(out, ref, atol=2e-3, rtol=2e-3), \
            f"mismatch vs JAX reference at B={B}"

    print("KERNEL_OK")
</pallas_src>

<mosaic_0001>
module attributes {stable_mosaic.version = 11 : i64} {
  func.func @qnet_kernel(%arg0: i32, %arg1: memref<8x4xf32, #tpu.memory_space<vmem>>, %arg2: memref<4x256xf32, #tpu.memory_space<vmem>>, %arg3: memref<1x256xf32, #tpu.memory_space<vmem>>, %arg4: memref<256x256xbf16, #tpu.memory_space<vmem>>, %arg5: memref<1x256xf32, #tpu.memory_space<vmem>>, %arg6: memref<256x128xbf16, #tpu.memory_space<vmem>>, %arg7: memref<1x128xf32, #tpu.memory_space<vmem>>, %arg8: memref<8x128xf32, #tpu.memory_space<vmem>>) attributes {dimension_semantics = [#tpu.dimension_semantics<parallel>], iteration_bounds = array<i64: 1>, scalar_prefetch = 0 : i64, scratch_operands = 0 : i64, tpu.core_type = #tpu.core_type<tc>, window_params = [{transform_indices = @transform_0, window_bounds = array<i64: 8, 4>}, {pipeline_mode = #tpu.pipeline_mode<synchronous>, transform_indices = @transform_1, window_bounds = array<i64: 4, 256>}, {pipeline_mode = #tpu.pipeline_mode<synchronous>, transform_indices = @transform_2, window_bounds = array<i64: 1, 256>}, {pipeline_mode = #tpu.pipeline_mode<synchronous>, transform_indices = @transform_3, window_bounds = array<i64: 256, 256>}, {pipeline_mode = #tpu.pipeline_mode<synchronous>, transform_indices = @transform_4, window_bounds = array<i64: 1, 256>}, {pipeline_mode = #tpu.pipeline_mode<synchronous>, transform_indices = @transform_5, window_bounds = array<i64: 256, 128>}, {pipeline_mode = #tpu.pipeline_mode<synchronous>, transform_indices = @transform_6, window_bounds = array<i64: 1, 128>}, {transform_indices = @transform_7, window_bounds = array<i64: 8, 128>}]} {
    %c0 = arith.constant 0 : index
    %c0_0 = arith.constant 0 : index
    %0 = vector.load %arg1[%c0, %c0_0] : memref<8x4xf32, #tpu.memory_space<vmem>>, vector<8x4xf32>
    %c0_1 = arith.constant 0 : index
    %c0_2 = arith.constant 0 : index
    %1 = vector.load %arg2[%c0_1, %c0_2] : memref<4x256xf32, #tpu.memory_space<vmem>>, vector<4x256xf32>
    %2 = vector.extract_strided_slice %0 {offsets = [0, 0], sizes = [8, 1], strides = [1, 1]} : vector<8x4xf32> to vector<8x1xf32>
    %3 = vector.extract_strided_slice %1 {offsets = [0, 0], sizes = [1, 256], strides = [1, 1]} : vector<4x256xf32> to vector<1x256xf32>
    %4 = vector.broadcast %2 : vector<8x1xf32> to vector<8x256xf32>
    %5 = vector.broadcast %3 : vector<1x256xf32> to vector<8x256xf32>
    %6 = arith.mulf %4, %5 : vector<8x256xf32>
    %7 = vector.extract_strided_slice %0 {offsets = [0, 1], sizes = [8, 1], strides = [1, 1]} : vector<8x4xf32> to vector<8x1xf32>
    %8 = vector.extract_strided_slice %1 {offsets = [1, 0], sizes = [1, 256], strides = [1, 1]} : vector<4x256xf32> to vector<1x256xf32>
    %9 = vector.broadcast %7 : vector<8x1xf32> to vector<8x256xf32>
    %10 = vector.broadcast %8 : vector<1x256xf32> to vector<8x256xf32>
    %11 = arith.mulf %9, %10 : vector<8x256xf32>
    %12 = arith.addf %6, %11 : vector<8x256xf32>
    %13 = vector.extract_strided_slice %0 {offsets = [0, 2], sizes = [8, 1], strides = [1, 1]} : vector<8x4xf32> to vector<8x1xf32>
    %14 = vector.extract_strided_slice %1 {offsets = [2, 0], sizes = [1, 256], strides = [1, 1]} : vector<4x256xf32> to vector<1x256xf32>
    %15 = vector.broadcast %13 : vector<8x1xf32> to vector<8x256xf32>
    %16 = vector.broadcast %14 : vector<1x256xf32> to vector<8x256xf32>
    %17 = arith.mulf %15, %16 : vector<8x256xf32>
    %18 = arith.addf %12, %17 : vector<8x256xf32>
    %19 = vector.extract_strided_slice %0 {offsets = [0, 3], sizes = [8, 1], strides = [1, 1]} : vector<8x4xf32> to vector<8x1xf32>
    %20 = vector.extract_strided_slice %1 {offsets = [3, 0], sizes = [1, 256], strides = [1, 1]} : vector<4x256xf32> to vector<1x256xf32>
    %21 = vector.broadcast %19 : vector<8x1xf32> to vector<8x256xf32>
    %22 = vector.broadcast %20 : vector<1x256xf32> to vector<8x256xf32>
    %23 = arith.mulf %21, %22 : vector<8x256xf32>
    %24 = arith.addf %18, %23 : vector<8x256xf32>
    %c0_3 = arith.constant 0 : index
    %c0_4 = arith.constant 0 : index
    %25 = vector.load %arg3[%c0_3, %c0_4] : memref<1x256xf32, #tpu.memory_space<vmem>>, vector<1x256xf32>
    %26 = vector.broadcast %25 : vector<1x256xf32> to vector<8x256xf32>
    %27 = arith.addf %24, %26 : vector<8x256xf32>
    %cst = arith.constant 0.000000e+00 : f32
    %28 = vector.broadcast %cst : f32 to vector<8x256xf32>
    %29 = arith.maximumf %27, %28 : vector<8x256xf32>
    %30 = arith.truncf %29 : vector<8x256xf32> to vector<8x256xbf16>
    %c0_5 = arith.constant 0 : index
    %c0_6 = arith.constant 0 : index
    %31 = vector.load %arg4[%c0_5, %c0_6] : memref<256x256xbf16, #tpu.memory_space<vmem>>, vector<256x256xbf16>
    %cst_7 = arith.constant dense<0.000000e+00> : vector<8x256xf32>
    %32 = tpu.matmul %30, %31, %cst_7 {dimension_numbers = #tpu.dot_dimension_numbers<[1], [0], [0], [1], [0, 0, 1, 1], [], []>} : vector<8x256xbf16>, vector<256x256xbf16>, vector<8x256xf32> -> vector<8x256xf32>
    %c0_8 = arith.constant 0 : index
    %c0_9 = arith.constant 0 : index
    %33 = vector.load %arg5[%c0_8, %c0_9] : memref<1x256xf32, #tpu.memory_space<vmem>>, vector<1x256xf32>
    %34 = vector.broadcast %33 : vector<1x256xf32> to vector<8x256xf32>
    %35 = arith.addf %32, %34 : vector<8x256xf32>
    %cst_10 = arith.constant 0.000000e+00 : f32
    %36 = vector.broadcast %cst_10 : f32 to vector<8x256xf32>
    %37 = arith.maximumf %35, %36 : vector<8x256xf32>
    %38 = arith.truncf %37 : vector<8x256xf32> to vector<8x256xbf16>
    %c0_11 = arith.constant 0 : index
    %c0_12 = arith.constant 0 : index
    %39 = vector.load %arg6[%c0_11, %c0_12] : memref<256x128xbf16, #tpu.memory_space<vmem>>, vector<256x128xbf16>
    %cst_13 = arith.constant dense<0.000000e+00> : vector<8x128xf32>
    %40 = tpu.matmul %38, %39, %cst_13 {dimension_numbers = #tpu.dot_dimension_numbers<[1], [0], [0], [1], [0, 0, 1, 1], [], []>} : vector<8x256xbf16>, vector<256x128xbf16>, vector<8x128xf32> -> vector<8x128xf32>
    %c0_14 = arith.constant 0 : index
    %c0_15 = arith.constant 0 : index
    %41 = vector.load %arg7[%c0_14, %c0_15] : memref<1x128xf32, #tpu.memory_space<vmem>>, vector<1x128xf32>
    %42 = vector.broadcast %41 : vector<1x128xf32> to vector<8x128xf32>
    %43 = arith.addf %40, %42 : vector<8x128xf32>
    %c0_16 = arith.constant 0 : index
    %c0_17 = arith.constant 0 : index
    %44 = vector.load %arg8[%c0_16, %c0_17] : memref<8x128xf32, #tpu.memory_space<vmem>>, vector<8x128xf32>
    tpu.vector_store %arg8[%c0_16, %c0_17], %43 {strides = array<i32>} : memref<8x128xf32, #tpu.memory_space<vmem>>, vector<8x128xf32>,
    return
  }
  func.func @transform_0(%arg0: i32) -> (i32, i32) {
    %c0_i32 = arith.constant 0 : i32
    %c0_i32_0 = arith.constant 0 : i32
    return %arg0, %c0_i32 : i32, i32
  }
  func.func @transform_1(%arg0: i32) -> (i32, i32) {
    %c0_i32 = arith.constant 0 : i32
    %c0_i32_0 = arith.constant 0 : i32
    %c0_i32_1 = arith.constant 0 : i32
    return %c0_i32, %c0_i32_0 : i32, i32
  }
  func.func @transform_2(%arg0: i32) -> (i32, i32) {
    %c0_i32 = arith.constant 0 : i32
    %c0_i32_0 = arith.constant 0 : i32
    %c0_i32_1 = arith.constant 0 : i32
    return %c0_i32, %c0_i32_0 : i32, i32
  }
  func.func @transform_3(%arg0: i32) -> (i32, i32) {
    %c0_i32 = arith.constant 0 : i32
    %c0_i32_0 = arith.constant 0 : i32
    %c0_i32_1 = arith.constant 0 : i32
    return %c0_i32, %c0_i32_0 : i32, i32
  }
  func.func @transform_4(%arg0: i32) -> (i32, i32) {
    %c0_i32 = arith.constant 0 : i32
    %c0_i32_0 = arith.constant 0 : i32
    %c0_i32_1 = arith.constant 0 : i32
    return %c0_i32, %c0_i32_0 : i32, i32
  }
  func.func @transform_5(%arg0: i32) -> (i32, i32) {
    %c0_i32 = arith.constant 0 : i32
    %c0_i32_0 = arith.constant 0 : i32
    %c0_i32_1 = arith.constant 0 : i32
    return %c0_i32, %c0_i32_0 : i32, i32
  }
  func.func @transform_6(%arg0: i32) -> (i32, i32) {
    %c0_i32 = arith.constant 0 : i32
    %c0_i32_0 = arith.constant 0 : i32
    %c0_i32_1 = arith.constant 0 : i32
    return %c0_i32, %c0_i32_0 : i32, i32
  }
  func.func @transform_7(%arg0: i32) -> (i32, i32) {
    %c0_i32 = arith.constant 0 : i32
    %c0_i32_0 = arith.constant 0 : i32
    return %arg0, %c0_i32 : i32, i32
  }
}

module attributes {stable_mosaic.version = 11 : i64} {
  func.func @qnet_kernel(%arg0: i32, %arg1: memref<8x4xf32, #tpu.memory_space<vmem>>, %arg2: memref<4x256xf32, #tpu.memory_space<vmem>>, %arg3: memref<1x256xf32, #tpu.memory_space<vmem>>, %arg4: memref<256x256xbf16, #tpu.memory_space<vmem>>, %arg5: memref<1x256xf32, #tpu.memory_space<vmem>>, %arg6: memref<256x128xbf16, #tpu.memory_space<vmem>>, %arg7: memref<1x128xf32, #tpu.memory_space<vmem>>, %arg8: memref<8x128xf32, #tpu.memory_space<vmem>>) attributes {dimension_semantics = [#tpu.dimension_semantics<parallel>], iteration_bounds = array<i64: 1>, scalar_prefetch = 0 : i64, scratch_operands = 0 : i64, tpu.core_type = #tpu.core_type<tc>, window_params = [{transform_indices = @transform_0, window_bounds = array<i64: 8, 4>}, {pipeline_mode = #tpu.pipeline_mode<synchronous>, transform_indices = @transform_1, window_bounds = array<i64: 4, 256>}, {pipeline_mode = #tpu.pipeline_mode<synchronous>, transform_indices = @transform_2, window_bounds = array<i64: 1, 256>}, {pipeline_mode = #tpu.pipeline_mode<synchronous>, transform_indices = @transform_3, window_bounds = array<i64: 256, 256>}, {pipeline_mode = #tpu.pipeline_mode<synchronous>, transform_indices = @transform_4, window_bounds = array<i64: 1, 256>}, {pipeline_mode = #tpu.pipeline_mode<synchronous>, transform_indices = @transform_5, window_bounds = array<i64: 256, 128>}, {pipeline_mode = #tpu.pipeline_mode<synchronous>, transform_indices = @transform_6, window_bounds = array<i64: 1, 128>}, {transform_indices = @transform_7, window_bounds = array<i64: 8, 128>}]} {
    %c0 = arith.constant 0 : index
    %c0_0 = arith.constant 0 : index
    %0 = vector.load %arg1[%c0, %c0_0] : memref<8x4xf32, #tpu.memory_space<vmem>>, vector<8x4xf32>
    %c0_1 = arith.constant 0 : index
    %c0_2 = arith.constant 0 : index
    %1 = vector.load %arg2[%c0_1, %c0_2] : memref<4x256xf32, #tpu.memory_space<vmem>>, vector<4x256xf32>
    %2 = vector.extract_strided_slice %0 {offsets = [0, 0], sizes = [8, 1], strides = [1, 1]} : vector<8x4xf32> to vector<8x1xf32>
    %3 = vector.extract_strided_slice %1 {offsets = [0, 0], sizes = [1, 256], strides = [1, 1]} : vector<4x256xf32> to vector<1x256xf32>
    %4 = vector.broadcast %2 : vector<8x1xf32> to vector<8x256xf32>
    %5 = vector.broadcast %3 : vector<1x256xf32> to vector<8x256xf32>
    %6 = arith.mulf %4, %5 : vector<8x256xf32>
    %7 = vector.extract_strided_slice %0 {offsets = [0, 1], sizes = [8, 1], strides = [1, 1]} : vector<8x4xf32> to vector<8x1xf32>
    %8 = vector.extract_strided_slice %1 {offsets = [1, 0], sizes = [1, 256], strides = [1, 1]} : vector<4x256xf32> to vector<1x256xf32>
    %9 = vector.broadcast %7 : vector<8x1xf32> to vector<8x256xf32>
    %10 = vector.broadcast %8 : vector<1x256xf32> to vector<8x256xf32>
    %11 = arith.mulf %9, %10 : vector<8x256xf32>
    %12 = arith.addf %6, %11 : vector<8x256xf32>
    %13 = vector.extract_strided_slice %0 {offsets = [0, 2], sizes = [8, 1], strides = [1, 1]} : vector<8x4xf32> to vector<8x1xf32>
    %14 = vector.extract_strided_slice %1 {offsets = [2, 0], sizes = [1, 256], strides = [1, 1]} : vector<4x256xf32> to vector<1x256xf32>
    %15 = vector.broadcast %13 : vector<8x1xf32> to vector<8x256xf32>
    %16 = vector.broadcast %14 : vector<1x256xf32> to vector<8x256xf32>
    %17 = arith.mulf %15, %16 : vector<8x256xf32>
    %18 = arith.addf %12, %17 : vector<8x256xf32>
    %19 = vector.extract_strided_slice %0 {offsets = [0, 3], sizes = [8, 1], strides = [1, 1]} : vector<8x4xf32> to vector<8x1xf32>
    %20 = vector.extract_strided_slice %1 {offsets = [3, 0], sizes = [1, 256], strides = [1, 1]} : vector<4x256xf32> to vector<1x256xf32>
    %21 = vector.broadcast %19 : vector<8x1xf32> to vector<8x256xf32>
    %22 = vector.broadcast %20 : vector<1x256xf32> to vector<8x256xf32>
    %23 = arith.mulf %21, %22 : vector<8x256xf32>
    %24 = arith.addf %18, %23 : vector<8x256xf32>
    %c0_3 = arith.constant 0 : index
    %c0_4 = arith.constant 0 : index
    %25 = vector.load %arg3[%c0_3, %c0_4] : memref<1x256xf32, #tpu.memory_space<vmem>>, vector<1x256xf32>
    %26 = vector.broadcast %25 : vector<1x256xf32> to vector<8x256xf32>
    %27 = arith.addf %24, %26 : vector<8x256xf32>
    %cst = arith.constant 0.000000e+00 : f32
    %28 = vector.broadcast %cst : f32 to vector<8x256xf32>
    %29 = arith.maximumf %27, %28 : vector<8x256xf32>
    %30 = arith.truncf %29 : vector<8x256xf32> to vector<8x256xbf16>
    %c0_5 = arith.constant 0 : index
    %c0_6 = arith.constant 0 : index
    %31 = vector.load %arg4[%c0_5, %c0_6] : memref<256x256xbf16, #tpu.memory_space<vmem>>, vector<256x256xbf16>
    %cst_7 = arith.constant dense<0.000000e+00> : vector<8x256xf32>
    %32 = tpu.matmul %30, %31, %cst_7 {dimension_numbers = #tpu.dot_dimension_numbers<[1], [0], [0], [1], [0, 0, 1, 1], [], []>} : vector<8x256xbf16>, vector<256x256xbf16>, vector<8x256xf32> -> vector<8x256xf32>
    %c0_8 = arith.constant 0 : index
    %c0_9 = arith.constant 0 : index
    %33 = vector.load %arg5[%c0_8, %c0_9] : memref<1x256xf32, #tpu.memory_space<vmem>>, vector<1x256xf32>
    %34 = vector.broadcast %33 : vector<1x256xf32> to vector<8x256xf32>
    %35 = arith.addf %32, %34 : vector<8x256xf32>
    %cst_10 = arith.constant 0.000000e+00 : f32
    %36 = vector.broadcast %cst_10 : f32 to vector<8x256xf32>
    %37 = arith.maximumf %35, %36 : vector<8x256xf32>
    %38 = arith.truncf %37 : vector<8x256xf32> to vector<8x256xbf16>
    %c0_11 = arith.constant 0 : index
    %c0_12 = arith.constant 0 : index
    %39 = vector.load %arg6[%c0_11, %c0_12] : memref<256x128xbf16, #tpu.memory_space<vmem>>, vector<256x128xbf16>
    %cst_13 = arith.constant dense<0.000000e+00> : vector<8x128xf32>
    %40 = tpu.matmul %38, %39, %cst_13 {dimension_numbers = #tpu.dot_dimension_numbers<[1], [0], [0], [1], [0, 0, 1, 1], [], []>} : vector<8x256xbf16>, vector<256x128xbf16>, vector<8x128xf32> -> vector<8x128xf32>
    %c0_14 = arith.constant 0 : index
    %c0_15 = arith.constant 0 : index
    %41 = vector.load %arg7[%c0_14, %c0_15] : memref<1x128xf32, #tpu.memory_space<vmem>>, vector<1x128xf32>
    %42 = vector.broadcast %41 : vector<1x128xf32> to vector<8x128xf32>
    %43 = arith.addf %40, %42 : vector<8x128xf32>
    %c0_16 = arith.constant 0 : index
    %c0_17 = arith.constant 0 : index
    %44 = vector.load %arg8[%c0_16, %c0_17] : memref<8x128xf32, #tpu.memory_space<vmem>>, vector<8x128xf32>
    tpu.vector_store %arg8[%c0_16, %c0_17], %43 {strides = array<i32>} : memref<8x128xf32, #tpu.memory_space<vmem>>, vector<8x128xf32>,
    return
  }
  func.func @transform_0(%arg0: i32) -> (i32, i32) {
    %c0_i32 = arith.constant 0 : i32
    %c0_i32_0 = arith.constant 0 : i32
    return %arg0, %c0_i32 : i32, i32
  }
  func.func @transform_1(%arg0: i32) -> (i32, i32) {
    %c0_i32 = arith.constant 0 : i32
    %c0_i32_0 = arith.constant 0 : i32
    %c0_i32_1 = arith.constant 0 : i32
    return %c0_i32, %c0_i32_0 : i32, i32
  }
  func.func @transform_2(%arg0: i32) -> (i32, i32) {
    %c0_i32 = arith.constant 0 : i32
    %c0_i32_0 = arith.constant 0 : i32
    %c0_i32_1 = arith.constant 0 : i32
    return %c0_i32, %c0_i32_0 : i32, i32
  }
  func.func @transform_3(%arg0: i32) -> (i32, i32) {
    %c0_i32 = arith.constant 0 : i32
    %c0_i32_0 = arith.constant 0 : i32
    %c0_i32_1 = arith.constant 0 : i32
    return %c0_i32, %c0_i32_0 : i32, i32
  }
  func.func @transform_4(%arg0: i32) -> (i32, i32) {
    %c0_i32 = arith.constant 0 : i32
    %c0_i32_0 = arith.constant 0 : i32
    %c0_i32_1 = arith.constant 0 : i32
    return %c0_i32, %c0_i32_0 : i32, i32
  }
  func.func @transform_5(%arg0: i32) -> (i32, i32) {
    %c0_i32 = arith.constant 0 : i32
    %c0_i32_0 = arith.constant 0 : i32
    %c0_i32_1 = arith.constant 0 : i32
    return %c0_i32, %c0_i32_0 : i32, i32
  }
  func.func @transform_6(%arg0: i32) -> (i32, i32) {
    %c0_i32 = arith.constant 0 : i32
    %c0_i32_0 = arith.constant 0 : i32
    %c0_i32_1 = arith.constant 0 : i32
    return %c0_i32, %c0_i32_0 : i32, i32
  }
  func.func @transform_7(%arg0: i32) -> (i32, i32) {
    %c0_i32 = arith.constant 0 : i32
    %c0_i32_0 = arith.constant 0 : i32
    return %arg0, %c0_i32 : i32, i32
  }
}

</mosaic_0001>

<bundles_post_ra>
// kernel: qnetwork_forward.1
= control target key start
LH: loop header
LB: loop body
LE: loop exit
PB: predicated region body
PF: predicated region fallthrough
CT: control target
= control target key end

     0   :  { %12 = vsyncpa [#allocation3], 0  ;;  %s914_s0 = inlined_call_operand.vmem [shape: f32[8,4], index: 0, kind: input, shape index: {}]   ;;  %s915_s1 = inlined_call_operand.vmem [shape: f32[4,256], index: 1, kind: input, shape index: {}]   ;;  %s916_s2 = inlined_call_operand.vmem [shape: f32[1,256], index: 2, kind: input, shape index: {}]   ;;  %s917_s3 = inlined_call_operand.hbm [shape: bf16[256,256], index: 3, kind: input, shape index: {}]   ;;  %s918_s4 = inlined_call_operand.vmem [shape: f32[1,256], index: 4, kind: input, shape index: {}]   ;;  %s919_s5 = inlined_call_operand.hbm [shape: bf16[256,128], index: 5, kind: input, shape index: {}]   ;;  %s920_s6 = inlined_call_operand.vmem [shape: f32[1,128], index: 6, kind: input, shape index: {}]   ;;  %s921_s7 = inlined_call_operand.vmem [shape: f32[8,128], index: 7, kind: output, shape index: {}]  }
   0x1   :  { %13 = vsyncpa [#allocation5], 0  ;;  %s808_s24 = smov [#allocation2]   ;;  %s760_s28 = scalar_lea.hbm %s917_s3, 4096 }
   0x2   :  { %s25_s25 = sshll.u32 %s808_s24, 4  ;;  %p761_p0 = scmp.ne.s32.totalorder %s917_s3, %s760_s28  ;;  %s26_s25 = int_to_ptr.vmem [resolvable:$true] %s25_s25 }
   0x3   :  { %p764_p1 = scmp.lt.u32.totalorder %s760_s28, %s917_s3 }
   0x5   :  { %p766_p2 = pnand %p764_p1, %p761_p0 }
   0x7   :  { %769 = shalt.err (!%p766_p2)
}
   0x8   :  { %s770_s10 = scalar_lea.vmem %s26_s25, 4096  ;;  %p775_p4 = scmp.lt.s32.totalorder %s26_s25, %s26_s25 }
   0x9   :  { %p771_p3 = scmp.ne.s32.totalorder %s26_s25, %s770_s10  ;;  %p776_p5 = scmp.lt.s32.totalorder %s770_s10, %s770_s10 }
   0xb   :  { %p777_p6 = por %p776_p5, %p775_p4 }
   0xd   :  { %p778_p7 = pnand %p777_p6, %p771_p3 }
   0xf   :  { %781 = shalt.err (!%p778_p7)
}
  0x10   :  { %s809_s11 = smov 128   ;;  %s810_s12 = smov 8  }
  0x11   :  { %31 = dma.hbm_to_vmem [thread:$0]  %s917_s3, 4096, %s26_s25, [#allocation3], %s809_s11, %s809_s11, %s810_s12  }
  0x12   :  { %s811_s15 = smov [#allocation4]   ;;  %s782_s19 = scalar_lea.hbm %s919_s5, 2048 }
  0x13   :  { %s39_s16 = sshll.u32 %s811_s15, 4  ;;  %p783_p8 = scmp.ne.s32.totalorder %s919_s5, %s782_s19  ;;  %s40_s16 = int_to_ptr.vmem [resolvable:$true] %s39_s16 }
  0x14   :  { %p786_p9 = scmp.lt.u32.totalorder %s782_s19, %s919_s5 }
  0x16   :  { %p788_p10 = pnand %p786_p9, %p783_p8 }
  0x18   :  { %791 = shalt.err (!%p788_p10)
}
  0x19   :  { %s792_s24 = scalar_lea.vmem %s40_s16, 2048  ;;  %p797_p12 = scmp.lt.s32.totalorder %s40_s16, %s40_s16 }
  0x1a   :  { %p793_p11 = scmp.ne.s32.totalorder %s40_s16, %s792_s24  ;;  %p798_p13 = scmp.lt.s32.totalorder %s792_s24, %s792_s24 }
  0x1c   :  { %p799_p0 = por %p798_p13, %p797_p12 }
  0x1e   :  { %p800_p1 = pnand %p799_p0, %p793_p11 }
  0x20   :  { %803 = shalt.err (!%p800_p1)
}
  0x21   :  { %s812_s3 = smov 64   ;;  %s813_s25 = smov 4  }
  0x22   :  { %45 = dma.hbm_to_vmem [thread:$0]  %s919_s5, 2048, %s40_s16, [#allocation5], %s812_s3, %s812_s3, %s813_s25  }
  0x23   :  { %804 = dma.done.wait [#allocation3], 4096  }
  0x24   :  { %805 = vsyncadd [#allocation3], 4294963200 }
  0x25   :  { %806 = dma.done.wait [#allocation5], 2048  }
  0x26   :  { %807 = vsyncadd [#allocation5], 4294965248  ;;  %v814_v0 = vmov 0   ;;  %v815_v1 = vmov 2   ;;  %v55_v2 = vld [vmem:[%s914_s0] sm:$0xff]  ;;  %v816_v7 = vmov 1   ;;  %v63_v49 = vlaneseq }
  0x27   :  { %691 = vset.pattern.permute.xlu0 %v814_v0  ;;  %693 = vset.pattern.permute.xlu1 %v815_v1  ;;  %v696_v3 = vld [vmem:[#allocation2 + $0x4] ss:$8 sps:$4 sm:$0xff]   ;;  %v698_v4 = vld [vmem:[#allocation2] ss:$8 sps:$4 sm:$0xff]   ;;  %v699_v5 = vld [vmem:[#allocation2 + $0x14] ss:$8 sps:$4 sm:$0xff]  }
  0x28   :  { %59 = vperm.xlu0 %691, %v55_v2   ;;  %110 = vperm.xlu1 %693, %v55_v2   ;;  %v701_v6 = vld [vmem:[#allocation2 + $0x10] ss:$8 sps:$4 sm:$0xff]   ;;  %v817_v8 = vmov 3   ;;  %v702_v9 = vld [vmem:[#allocation2 + $0x24] ss:$8 sps:$4 sm:$0xff]   ;;  %v64_v50 = vshrl.u32 %v63_v49, 7 }
  0x29   :  { %383 = vmatprep.subr.bf16.mxu0 %v696_v3  ;;  %v704_v10 = vld [vmem:[#allocation2 + $0x20] ss:$8 sps:$4 sm:$0xff]   ;;  %v705_v11 = vld [vmem:[#allocation2 + $0x34] ss:$8 sps:$4 sm:$0xff]   ;;  %v707_v12 = vld [vmem:[#allocation2 + $0x30] ss:$8 sps:$4 sm:$0xff]  }
  0x2a   :  { %384 = vmatpush1.bf16.msra.mxu0 %v698_v4  ;;  %v708_v13 = vld [vmem:[#allocation2 + $0x44] ss:$8 sps:$4 sm:$0xff]   ;;  %v710_v14 = vld [vmem:[#allocation2 + $0x40] ss:$8 sps:$4 sm:$0xff]   ;;  %v711_v15 = vld [vmem:[#allocation2 + $0x54] ss:$8 sps:$4 sm:$0xff]  }
  0x2b   :  { %385 = vmatprep.subr.bf16.mxu0 %v699_v5  ;;  %v713_v16 = vld [vmem:[#allocation2 + $0x50] ss:$8 sps:$4 sm:$0xff]   ;;  %v714_v17 = vld [vmem:[#allocation2 + $0x64] ss:$8 sps:$4 sm:$0xff]   ;;  %v716_v18 = vld [vmem:[#allocation2 + $0x60] ss:$8 sps:$4 sm:$0xff]  }
  0x2c   :  { %692 = vset.pattern.permute.xlu0 %v816_v7  ;;  %694 = vset.pattern.permute.xlu1 %v817_v8  ;;  %v717_v19 = vld [vmem:[#allocation2 + $0x74] ss:$8 sps:$4 sm:$0xff]   ;;  %v744_v20 = vld [vmem:[#allocation4 + $0x40] sm:$0xff]   ;;  %v746_v22 = vld [vmem:[#allocation4 + $0x48] sm:$0xff]   ;;  %v885_v51 = vsub.s32 0, %v64_v50  ;;  %v69_v52 = vsub.s32 4, %v64_v50 }
  0x2d   :  { %84 = vperm.xlu0 %692, %v55_v2   ;;  %136 = vperm.xlu1 %694, %v55_v2   ;;  %v745_v21 = vld [vmem:[#allocation4] sm:$0xff]   ;;  %v747_v23 = vld [vmem:[#allocation4 + $0x8] sm:$0xff]   ;;  %v748_v24 = vld [vmem:[#allocation4 + $0x50] sm:$0xff]   ;;  %v887_v53 = vsub.s32 1, %v64_v50  ;;  %v93_v54 = vsub.s32 5, %v64_v50  ;;  %v115_v56 = vsub.s32 2, %v64_v50 }
  0x2e   :  { %386 = vmatpush1.bf16.msra.mxu0 %v701_v6  ;;  %659 = vmatprep.subr.bf16.mxu1 %v744_v20  ;;  %v719_v25 = vld [vmem:[#allocation2 + $0x70] ss:$8 sps:$4 sm:$0xff]   ;;  %v720_v26 = vld [vmem:[#allocation2 + $0x84] ss:$8 sps:$4 sm:$0xff]   ;;  %v722_v29 = vld [vmem:[#allocation2 + $0x80] ss:$8 sps:$4 sm:$0xff]  }
  0x2f   :  { %387 = vmatprep.subr.bf16.mxu0 %v702_v9  ;;  %660 = vmatpush3.bf16.msra.mxu1 %v745_v21  ;;  %v749_v27 = vld [vmem:[#allocation4 + $0x10] sm:$0xff]   ;;  %v750_v28 = vld [vmem:[#allocation4 + $0x58] sm:$0xff]   ;;  %v752_v33 = vld [vmem:[#allocation4 + $0x60] sm:$0xff]   ;;  %v119_v57 = vsub.s32 6, %v64_v50  ;;  %v141_v58 = vsub.s32 3, %v64_v50  ;;  %v145_v59 = vsub.s32 7, %v64_v50 }
  0x30   :  { %661 = vmatprep.subr.bf16.mxu1 %v746_v22  ;;  %v723_v30 = vld [vmem:[#allocation2 + $0x94] ss:$8 sps:$4 sm:$0xff]   ;;  %v725_v31 = vld [vmem:[#allocation2 + $0x90] ss:$8 sps:$4 sm:$0xff]   ;;  %v726_v34 = vld [vmem:[#allocation2 + $0xa4] ss:$8 sps:$4 sm:$0xff]  }
  0x31   :  { %695 = vset.pattern.permute.xlu0 %v817_v8  ;;  %v751_v32 = vld [vmem:[#allocation4 + $0x18] sm:$0xff]   ;;  %v753_v35 = vld [vmem:[#allocation4 + $0x20] sm:$0xff]   ;;  %v754_v36 = vld [vmem:[#allocation4 + $0x68] sm:$0xff]  }
  0x32   :  { %388 = vmatpush1.bf16.msra.mxu0 %v704_v10  ;;  %v728_v37 = vld [vmem:[#allocation2 + $0xa0] ss:$8 sps:$4 sm:$0xff]   ;;  %v729_v38 = vld [vmem:[#allocation2 + $0xb4] ss:$8 sps:$4 sm:$0xff]   ;;  %v731_v40 = vld [vmem:[#allocation2 + $0xb0] ss:$8 sps:$4 sm:$0xff]  }
  0x33   :  { %389 = vmatprep.subr.bf16.mxu0 %v705_v11  ;;  %662 = vmatpush3.bf16.msra.mxu1 %v747_v23  ;;  %v755_v39 = vld [vmem:[#allocation4 + $0x28] sm:$0xff]   ;;  %v735_v43 = vld [vmem:[#allocation2 + $0xd4] ss:$8 sps:$4 sm:$0xff]   ;;  %v737_v44 = vld [vmem:[#allocation2 + $0xd0] ss:$8 sps:$4 sm:$0xff]  }
  0x34   :  { %663 = vmatprep.subr.bf16.mxu1 %v748_v24  ;;  %v732_v41 = vld [vmem:[#allocation2 + $0xc4] ss:$8 sps:$4 sm:$0xff]   ;;  %v734_v42 = vld [vmem:[#allocation2 + $0xc0] ss:$8 sps:$4 sm:$0xff]   ;;  %v741_v47 = vld [vmem:[#allocation2 + $0xf4] ss:$8 sps:$4 sm:$0xff]  }
  0x35   :  { %v738_v45 = vld [vmem:[#allocation2 + $0xe4] ss:$8 sps:$4 sm:$0xff]   ;;  %v740_v46 = vld [vmem:[#allocation2 + $0xe0] ss:$8 sps:$4 sm:$0xff]   ;;  %v743_v48 = vld [vmem:[#allocation2 + $0xf0] ss:$8 sps:$4 sm:$0xff]  }
  0x36   :  { %390 = vmatpush1.bf16.msra.mxu0 %v707_v12  ;;  %v56_v55 = vld [vmem:[%s915_s1] sm:$0xff] }
  0x37   :  { %391 = vmatprep.subr.bf16.mxu0 %v708_v13  ;;  %664 = vmatpush3.bf16.msra.mxu1 %v749_v27  ;;  %v66_v60 = vrot.slane %v56_v55, %v885_v51  ;;  %v70_v61 = vrot.slane %v56_v55, %v69_v52  ;;  %v90_v62 = vrot.slane %v56_v55, %v887_v53  ;;  %v161_v22 = vld [vmem:[%s916_s2] sm:$0x3] }
  0x38   :  { %665 = vmatprep.subr.bf16.mxu1 %v750_v28  ;;  %v94_v63 = vrot.slane %v56_v55, %v93_v54  ;;  %v116_v0 = vrot.slane %v56_v55, %v115_v56  ;;  %v120_v1 = vrot.slane %v56_v55, %v119_v57  ;;  %v142_v4 = vrot.slane %v56_v55, %v141_v58 }
  0x39   :  { %v146_v5 = vrot.slane %v56_v55, %v145_v59  ;;  %v76_v6 = vrot.slane %v66_v60, %v885_v51  ;;  %v80_v7 = vrot.slane %v70_v61, %v885_v51  ;;  %v100_v8 = vrot.slane %v90_v62, %v887_v53  ;;  %v642_v59 = vld [vmem:[%s920_s6] ss:$0 sm:$0xff] }
  0x3a   :  { %392 = vmatpush1.bf16.msra.mxu0 %v710_v14  ;;  %v104_v9 = vrot.slane %v94_v63, %v887_v53  ;;  %v126_v10 = vrot.slane %v116_v0, %v115_v56  ;;  %v130_v11 = vrot.slane %v120_v1, %v115_v56  ;;  %v152_v12 = vrot.slane %v142_v4, %v141_v58 }
  0x3b   :  { %393 = vmatprep.subr.bf16.mxu0 %v711_v15  ;;  %666 = vmatpush3.bf16.msra.mxu1 %v751_v32  ;;  %v156_v13 = vrot.slane %v146_v5, %v141_v58 }
  0x3c   :  { %667 = vmatprep.subr.bf16.mxu1 %v752_v33 }
  0x3e   :  { %394 = vmatpush1.bf16.msra.mxu0 %v713_v16 }
  0x3f   :  { %395 = vmatprep.subr.bf16.mxu0 %v714_v17  ;;  %668 = vmatpush3.bf16.msra.mxu1 %v753_v35 }
  0x40   :  { %669 = vmatprep.subr.bf16.mxu1 %v754_v36 }
  0x42   :  { %396 = vmatpush1.bf16.msra.mxu0 %v716_v18 }
  0x43   :  { %397 = vmatprep.subr.bf16.mxu0 %v717_v19  ;;  %670 = vmatpush3.bf16.msra.mxu1 %v755_v39  ;;  %v756_v39 = vld [vmem:[#allocation4 + $0x70] sm:$0xff]  }
  0x44   :  { %671 = vmatprep.subr.bf16.mxu1 %v756_v39 }
  0x46   :  { %398 = vmatpush1.bf16.msra.mxu0 %v719_v25 }
  0x47   :  { %399 = vmatprep.subr.bf16.mxu0 %v720_v26 }
  0x4a   :  { %400 = vmatpush1.bf16.msra.mxu0 %v722_v29  ;;  %v166_v29 = vrot.slane %v161_v22, %v885_v51 }
  0x4b   :  { %401 = vmatprep.subr.bf16.mxu0 %v723_v30  ;;  %v170_v30 = vrot.slane %v161_v22, %v887_v53 }
  0x4e   :  { %402 = vmatpush1.bf16.msra.mxu0 %v725_v31 }
  0x4f   :  { %403 = vmatprep.subr.bf16.mxu0 %v726_v34 }
  0x52   :  { %404 = vmatpush1.bf16.msra.mxu0 %v728_v37 }
  0x53   :  { %405 = vmatprep.subr.bf16.mxu0 %v729_v38 }
  0x56   :  { %406 = vmatpush1.bf16.msra.mxu0 %v731_v40  ;;  %v757_v40 = vld [vmem:[#allocation4 + $0x30] sm:$0xff]  }
  0x57   :  { %407 = vmatprep.subr.bf16.mxu0 %v732_v41  ;;  %672 = vmatpush3.bf16.msra.mxu1 %v757_v40  ;;  %v758_v41 = vld [vmem:[#allocation4 + $0x78] sm:$0xff]  }
  0x58   :  { %673 = vmatprep.subr.bf16.mxu1 %v758_v41 }
  0x5a   :  { %408 = vmatpush1.bf16.msra.mxu0 %v734_v42  ;;  %v759_v42 = vld [vmem:[#allocation4 + $0x38] sm:$0xff]  }
  0x5b   :  { %409 = vmatprep.subr.bf16.mxu0 %v735_v43  ;;  %674 = vmatpush3.bf16.msra.mxu1 %v759_v42  ;;  %v211_v43 = vld [vmem:[%s918_s4] sm:$0x3] }
  0x5e   :  { %410 = vmatpush1.bf16.msra.mxu0 %v737_v44  ;;  %v216_v44 = vrot.slane %v211_v43, %v885_v51 }
  0x5f   :  { %411 = vmatprep.subr.bf16.mxu0 %v738_v45  ;;  %v220_v45 = vrot.slane %v211_v43, %v887_v53 }
  0x62   :  { %412 = vmatpush1.bf16.msra.mxu0 %v740_v46 }
  0x63   :  { %413 = vmatprep.subr.bf16.mxu0 %v741_v47 }
  0x66   :  { %414 = vmatpush1.bf16.msra.mxu0 %v743_v48 }
  0xa7   :  { %v60_v2 = vpop.permute.xlu0 %59  ;;  %v111_v3 = vpop.permute.xlu1 %110 }
  0xa8   :  { %v81_v16 = vmul.f32 %v76_v6, %v60_v2  ;;  %v82_v17 = vmul.f32 %v80_v7, %v60_v2  ;;  %v131_v20 = vmul.f32 %v126_v10, %v111_v3  ;;  %v132_v21 = vmul.f32 %v130_v11, %v111_v3 }
  0xac   :  { %v85_v14 = vpop.permute.xlu0 %84  ;;  %v137_v15 = vpop.permute.xlu1 %136 }
  0xad   :  { %v105_v18 = vmul.f32 %v100_v8, %v85_v14  ;;  %v106_v19 = vmul.f32 %v104_v9, %v85_v14  ;;  %v157_v25 = vmul.f32 %v152_v12, %v137_v15  ;;  %v158_v26 = vmul.f32 %v156_v13, %v137_v15 }
  0xaf   :  { %v107_v23 = vadd.f32 %v105_v18, %v81_v16  ;;  %v108_v24 = vadd.f32 %v106_v19, %v82_v17 }
  0xb1   :  { %v133_v27 = vadd.f32 %v131_v20, %v107_v23  ;;  %v134_v28 = vadd.f32 %v132_v21, %v108_v24 }
  0xb3   :  { %v159_v31 = vadd.f32 %v157_v25, %v133_v27  ;;  %v160_v32 = vadd.f32 %v158_v26, %v134_v28 }
  0xb5   :  { %v174_v33 = vadd.f32 %v170_v30, %v160_v32  ;;  %v173_v34 = vadd.f32 %v166_v29, %v159_v31 }
  0xb7   :  { %v176_v35 = vmax.f32 %v174_v33, 0.0  ;;  %v175_v36 = vmax.f32 %v173_v34, 0.0 }
  0xb9   :  { %v178_v37 = vpack.c.bf16 %v176_v35, %v176_v35  ;;  %v177_v38 = vpack.c.bf16 %v175_v36, %v175_v36 }
  0xbb   :  { %415 = vmatprep.mubr.bf16.mxu0 %v178_v37 }
  0xbc   :  { %416 = vmatmul.mubr.bf16.vlgmr.msra.gmra.mrb[0].mxu0 %v177_v38 }
 0x18f   :  { %v417_v46 = vpop.f32.mrb[0].mxu0 }
 0x190   :  { %v418_v47 = vadd.f32 %v417_v46, %v216_v44  ;;  %v419_v48 = vpop.f32.mrb[1].mxu0 }
 0x191   :  { %v420_v49 = vadd.f32 %v419_v48, %v220_v45  ;;  %v421_v50 = vpop.f32.mrb[2].mxu0 }
 0x192   :  { %v424_v52 = vmax.f32 %v418_v47, 0.0  ;;  %v422_v54 = vpop.f32.mrb[3].mxu0 }
 0x193   :  { %v425_v55 = vmax.f32 %v420_v49, 0.0 }
 0x194   :  { %v426_v57 = vpack.c.bf16 %v424_v52, %v424_v52 }
 0x195   :  { %v427_v56 = vpack.c.bf16 %v425_v55, %v425_v55 }
 0x197   :  { %595 = vmatprep.mubr.bf16.mxu1 %v427_v56 }
 0x198   :  { %596 = vmatmul.mubr.bf16.vlgmr.msra.gmra.mrb[0].mxu1 %v426_v57 }
 0x26b   :  { %v675_v58 = vpop.f32.mrb[0].mxu1 }
 0x26c   :  { %v676_v51 = vpop.f32.mrb[1].mxu1 }
 0x26d   :  { %v677_v60 = vadd.f32 %v676_v51, %v675_v58  ;;  %v678_v53 = vpop.f32.mrb[2].mxu1 }
 0x26e   :  { %v679_v61 = vpop.f32.mrb[3].mxu1 }
 0x26f   :  { %v598_v62 = vadd.f32 %v677_v60, %v642_v59 }
 0x271   :  { %603 = vst [vmem:[%s921_s7] sm:$0xff] %v598_v62 }
 0x272   :  { %608 = vsyncpa [#allocation3], 1 }
 0x273   :  { %609 = vsyncpa [#allocation5], 1 }

// kernel: qnetwork_forward.1
= control target key start
LH: loop header
LB: loop body
LE: loop exit
PB: predicated region body
PF: predicated region fallthrough
CT: control target
= control target key end

     0   :  { %12 = vsyncpa [#allocation3], 0  ;;  %s914_s0 = inlined_call_operand.vmem [shape: f32[8,4], index: 0, kind: input, shape index: {}]   ;;  %s915_s1 = inlined_call_operand.vmem [shape: f32[4,256], index: 1, kind: input, shape index: {}]   ;;  %s916_s2 = inlined_call_operand.vmem [shape: f32[1,256], index: 2, kind: input, shape index: {}]   ;;  %s917_s3 = inlined_call_operand.hbm [shape: bf16[256,256], index: 3, kind: input, shape index: {}]   ;;  %s918_s4 = inlined_call_operand.vmem [shape: f32[1,256], index: 4, kind: input, shape index: {}]   ;;  %s919_s5 = inlined_call_operand.hbm [shape: bf16[256,128], index: 5, kind: input, shape index: {}]   ;;  %s920_s6 = inlined_call_operand.vmem [shape: f32[1,128], index: 6, kind: input, shape index: {}]   ;;  %s921_s7 = inlined_call_operand.vmem [shape: f32[8,128], index: 7, kind: output, shape index: {}]  }
   0x1   :  { %13 = vsyncpa [#allocation5], 0  ;;  %s808_s24 = smov [#allocation2]   ;;  %s760_s28 = scalar_lea.hbm %s917_s3, 4096 }
   0x2   :  { %s25_s25 = sshll.u32 %s808_s24, 4  ;;  %p761_p0 = scmp.ne.s32.totalorder %s917_s3, %s760_s28  ;;  %s26_s25 = int_to_ptr.vmem [resolvable:$true] %s25_s25 }
   0x3   :  { %p764_p1 = scmp.lt.u32.totalorder %s760_s28, %s917_s3 }
   0x5   :  { %p766_p2 = pnand %p764_p1, %p761_p0 }
   0x7   :  { %769 = shalt.err (!%p766_p2)
}
   0x8   :  { %s770_s10 = scalar_lea.vmem %s26_s25, 4096  ;;  %p775_p4 = scmp.lt.s32.totalorder %s26_s25, %s26_s25 }
   0x9   :  { %p771_p3 = scmp.ne.s32.totalorder %s26_s25, %s770_s10  ;;  %p776_p5 = scmp.lt.s32.totalorder %s770_s10, %s770_s10 }
   0xb   :  { %p777_p6 = por %p776_p5, %p775_p4 }
   0xd   :  { %p778_p7 = pnand %p777_p6, %p771_p3 }
   0xf   :  { %781 = shalt.err (!%p778_p7)
}
  0x10   :  { %s809_s11 = smov 128   ;;  %s810_s12 = smov 8  }
  0x11   :  { %31 = dma.hbm_to_vmem [thread:$0]  %s917_s3, 4096, %s26_s25, [#allocation3], %s809_s11, %s809_s11, %s810_s12  }
  0x12   :  { %s811_s15 = smov [#allocation4]   ;;  %s782_s19 = scalar_lea.hbm %s919_s5, 2048 }
  0x13   :  { %s39_s16 = sshll.u32 %s811_s15, 4  ;;  %p783_p8 = scmp.ne.s32.totalorder %s919_s5, %s782_s19  ;;  %s40_s16 = int_to_ptr.vmem [resolvable:$true] %s39_s16 }
  0x14   :  { %p786_p9 = scmp.lt.u32.totalorder %s782_s19, %s919_s5 }
  0x16   :  { %p788_p10 = pnand %p786_p9, %p783_p8 }
  0x18   :  { %791 = shalt.err (!%p788_p10)
}
  0x19   :  { %s792_s24 = scalar_lea.vmem %s40_s16, 2048  ;;  %p797_p12 = scmp.lt.s32.totalorder %s40_s16, %s40_s16 }
  0x1a   :  { %p793_p11 = scmp.ne.s32.totalorder %s40_s16, %s792_s24  ;;  %p798_p13 = scmp.lt.s32.totalorder %s792_s24, %s792_s24 }
  0x1c   :  { %p799_p0 = por %p798_p13, %p797_p12 }
  0x1e   :  { %p800_p1 = pnand %p799_p0, %p793_p11 }
  0x20   :  { %803 = shalt.err (!%p800_p1)
}
  0x21   :  { %s812_s3 = smov 64   ;;  %s813_s25 = smov 4  }
  0x22   :  { %45 = dma.hbm_to_vmem [thread:$0]  %s919_s5, 2048, %s40_s16, [#allocation5], %s812_s3, %s812_s3, %s813_s25  }
  0x23   :  { %804 = dma.done.wait [#allocation3], 4096  }
  0x24   :  { %805 = vsyncadd [#allocation3], 4294963200 }
  0x25   :  { %806 = dma.done.wait [#allocation5], 2048  }
  0x26   :  { %807 = vsyncadd [#allocation5], 4294965248  ;;  %v814_v0 = vmov 0   ;;  %v815_v1 = vmov 2   ;;  %v55_v2 = vld [vmem:[%s914_s0] sm:$0xff]  ;;  %v816_v7 = vmov 1   ;;  %v63_v49 = vlaneseq }
  0x27   :  { %691 = vset.pattern.permute.xlu0 %v814_v0  ;;  %693 = vset.pattern.permute.xlu1 %v815_v1  ;;  %v696_v3 = vld [vmem:[#allocation2 + $0x4] ss:$8 sps:$4 sm:$0xff]   ;;  %v698_v4 = vld [vmem:[#allocation2] ss:$8 sps:$4 sm:$0xff]   ;;  %v699_v5 = vld [vmem:[#allocation2 + $0x14] ss:$8 sps:$4 sm:$0xff]  }
  0x28   :  { %59 = vperm.xlu0 %691, %v55_v2   ;;  %110 = vperm.xlu1 %693, %v55_v2   ;;  %v701_v6 = vld [vmem:[#allocation2 + $0x10] ss:$8 sps:$4 sm:$0xff]   ;;  %v817_v8 = vmov 3   ;;  %v702_v9 = vld [vmem:[#allocation2 + $0x24] ss:$8 sps:$4 sm:$0xff]   ;;  %v64_v50 = vshrl.u32 %v63_v49, 7 }
  0x29   :  { %383 = vmatprep.subr.bf16.mxu0 %v696_v3  ;;  %v704_v10 = vld [vmem:[#allocation2 + $0x20] ss:$8 sps:$4 sm:$0xff]   ;;  %v705_v11 = vld [vmem:[#allocation2 + $0x34] ss:$8 sps:$4 sm:$0xff]   ;;  %v707_v12 = vld [vmem:[#allocation2 + $0x30] ss:$8 sps:$4 sm:$0xff]  }
  0x2a   :  { %384 = vmatpush1.bf16.msra.mxu0 %v698_v4  ;;  %v708_v13 = vld [vmem:[#allocation2 + $0x44] ss:$8 sps:$4 sm:$0xff]   ;;  %v710_v14 = vld [vmem:[#allocation2 + $0x40] ss:$8 sps:$4 sm:$0xff]   ;;  %v711_v15 = vld [vmem:[#allocation2 + $0x54] ss:$8 sps:$4 sm:$0xff]  }
  0x2b   :  { %385 = vmatprep.subr.bf16.mxu0 %v699_v5  ;;  %v713_v16 = vld [vmem:[#allocation2 + $0x50] ss:$8 sps:$4 sm:$0xff]   ;;  %v714_v17 = vld [vmem:[#allocation2 + $0x64] ss:$8 sps:$4 sm:$0xff]   ;;  %v716_v18 = vld [vmem:[#allocation2 + $0x60] ss:$8 sps:$4 sm:$0xff]  }
  0x2c   :  { %692 = vset.pattern.permute.xlu0 %v816_v7  ;;  %694 = vset.pattern.permute.xlu1 %v817_v8  ;;  %v717_v19 = vld [vmem:[#allocation2 + $0x74] ss:$8 sps:$4 sm:$0xff]   ;;  %v744_v20 = vld [vmem:[#allocation4 + $0x40] sm:$0xff]   ;;  %v746_v22 = vld [vmem:[#allocation4 + $0x48] sm:$0xff]   ;;  %v885_v51 = vsub.s32 0, %v64_v50  ;;  %v69_v52 = vsub.s32 4, %v64_v50 }
  0x2d   :  { %84 = vperm.xlu0 %692, %v55_v2   ;;  %136 = vperm.xlu1 %694, %v55_v2   ;;  %v745_v21 = vld [vmem:[#allocation4] sm:$0xff]   ;;  %v747_v23 = vld [vmem:[#allocation4 + $0x8] sm:$0xff]   ;;  %v748_v24 = vld [vmem:[#allocation4 + $0x50] sm:$0xff]   ;;  %v887_v53 = vsub.s32 1, %v64_v50  ;;  %v93_v54 = vsub.s32 5, %v64_v50  ;;  %v115_v56 = vsub.s32 2, %v64_v50 }
  0x2e   :  { %386 = vmatpush1.bf16.msra.mxu0 %v701_v6  ;;  %659 = vmatprep.subr.bf16.mxu1 %v744_v20  ;;  %v719_v25 = vld [vmem:[#allocation2 + $0x70] ss:$8 sps:$4 sm:$0xff]   ;;  %v720_v26 = vld [vmem:[#allocation2 + $0x84] ss:$8 sps:$4 sm:$0xff]   ;;  %v722_v29 = vld [vmem:[#allocation2 + $0x80] ss:$8 sps:$4 sm:$0xff]  }
  0x2f   :  { %387 = vmatprep.subr.bf16.mxu0 %v702_v9  ;;  %660 = vmatpush3.bf16.msra.mxu1 %v745_v21  ;;  %v749_v27 = vld [vmem:[#allocation4 + $0x10] sm:$0xff]   ;;  %v750_v28 = vld [vmem:[#allocation4 + $0x58] sm:$0xff]   ;;  %v752_v33 = vld [vmem:[#allocation4 + $0x60] sm:$0xff]   ;;  %v119_v57 = vsub.s32 6, %v64_v50  ;;  %v141_v58 = vsub.s32 3, %v64_v50  ;;  %v145_v59 = vsub.s32 7, %v64_v50 }
  0x30   :  { %661 = vmatprep.subr.bf16.mxu1 %v746_v22  ;;  %v723_v30 = vld [vmem:[#allocation2 + $0x94] ss:$8 sps:$4 sm:$0xff]   ;;  %v725_v31 = vld [vmem:[#allocation2 + $0x90] ss:$8 sps:$4 sm:$0xff]   ;;  %v726_v34 = vld [vmem:[#allocation2 + $0xa4] ss:$8 sps:$4 sm:$0xff]  }
  0x31   :  { %695 = vset.pattern.permute.xlu0 %v817_v8  ;;  %v751_v32 = vld [vmem:[#allocation4 + $0x18] sm:$0xff]   ;;  %v753_v35 = vld [vmem:[#allocation4 + $0x20] sm:$0xff]   ;;  %v754_v36 = vld [vmem:[#allocation4 + $0x68] sm:$0xff]  }
  0x32   :  { %388 = vmatpush1.bf16.msra.mxu0 %v704_v10  ;;  %v728_v37 = vld [vmem:[#allocation2 + $0xa0] ss:$8 sps:$4 sm:$0xff]   ;;  %v729_v38 = vld [vmem:[#allocation2 + $0xb4] ss:$8 sps:$4 sm:$0xff]   ;;  %v731_v40 = vld [vmem:[#allocation2 + $0xb0] ss:$8 sps:$4 sm:$0xff]  }
  0x33   :  { %389 = vmatprep.subr.bf16.mxu0 %v705_v11  ;;  %662 = vmatpush3.bf16.msra.mxu1 %v747_v23  ;;  %v755_v39 = vld [vmem:[#allocation4 + $0x28] sm:$0xff]   ;;  %v735_v43 = vld [vmem:[#allocation2 + $0xd4] ss:$8 sps:$4 sm:$0xff]   ;;  %v737_v44 = vld [vmem:[#allocation2 + $0xd0] ss:$8 sps:$4 sm:$0xff]  }
  0x34   :  { %663 = vmatprep.subr.bf16.mxu1 %v748_v24  ;;  %v732_v41 = vld [vmem:[#allocation2 + $0xc4] ss:$8 sps:$4 sm:$0xff]   ;;  %v734_v42 = vld [vmem:[#allocation2 + $0xc0] ss:$8 sps:$4 sm:$0xff]   ;;  %v741_v47 = vld [vmem:[#allocation2 + $0xf4] ss:$8 sps:$4 sm:$0xff]  }
  0x35   :  { %v738_v45 = vld [vmem:[#allocation2 + $0xe4] ss:$8 sps:$4 sm:$0xff]   ;;  %v740_v46 = vld [vmem:[#allocation2 + $0xe0] ss:$8 sps:$4 sm:$0xff]   ;;  %v743_v48 = vld [vmem:[#allocation2 + $0xf0] ss:$8 sps:$4 sm:$0xff]  }
  0x36   :  { %390 = vmatpush1.bf16.msra.mxu0 %v707_v12  ;;  %v56_v55 = vld [vmem:[%s915_s1] sm:$0xff] }
  0x37   :  { %391 = vmatprep.subr.bf16.mxu0 %v708_v13  ;;  %664 = vmatpush3.bf16.msra.mxu1 %v749_v27  ;;  %v66_v60 = vrot.slane %v56_v55, %v885_v51  ;;  %v70_v61 = vrot.slane %v56_v55, %v69_v52  ;;  %v90_v62 = vrot.slane %v56_v55, %v887_v53  ;;  %v161_v22 = vld [vmem:[%s916_s2] sm:$0x3] }
  0x38   :  { %665 = vmatprep.subr.bf16.mxu1 %v750_v28  ;;  %v94_v63 = vrot.slane %v56_v55, %v93_v54  ;;  %v116_v0 = vrot.slane %v56_v55, %v115_v56  ;;  %v120_v1 = vrot.slane %v56_v55, %v119_v57  ;;  %v142_v4 = vrot.slane %v56_v55, %v141_v58 }
  0x39   :  { %v146_v5 = vrot.slane %v56_v55, %v145_v59  ;;  %v76_v6 = vrot.slane %v66_v60, %v885_v51  ;;  %v80_v7 = vrot.slane %v70_v61, %v885_v51  ;;  %v100_v8 = vrot.slane %v90_v62, %v887_v53  ;;  %v642_v59 = vld [vmem:[%s920_s6] ss:$0 sm:$0xff] }
  0x3a   :  { %392 = vmatpush1.bf16.msra.mxu0 %v710_v14  ;;  %v104_v9 = vrot.slane %v94_v63, %v887_v53  ;;  %v126_v10 = vrot.slane %v116_v0, %v115_v56  ;;  %v130_v11 = vrot.slane %v120_v1, %v115_v56  ;;  %v152_v12 = vrot.slane %v142_v4, %v141_v58 }
  0x3b   :  { %393 = vmatprep.subr.bf16.mxu0 %v711_v15  ;;  %666 = vmatpush3.bf16.msra.mxu1 %v751_v32  ;;  %v156_v13 = vrot.slane %v146_v5, %v141_v58 }
  0x3c   :  { %667 = vmatprep.subr.bf16.mxu1 %v752_v33 }
  0x3e   :  { %394 = vmatpush1.bf16.msra.mxu0 %v713_v16 }
  0x3f   :  { %395 = vmatprep.subr.bf16.mxu0 %v714_v17  ;;  %668 = vmatpush3.bf16.msra.mxu1 %v753_v35 }
  0x40   :  { %669 = vmatprep.subr.bf16.mxu1 %v754_v36 }
  0x42   :  { %396 = vmatpush1.bf16.msra.mxu0 %v716_v18 }
  0x43   :  { %397 = vmatprep.subr.bf16.mxu0 %v717_v19  ;;  %670 = vmatpush3.bf16.msra.mxu1 %v755_v39  ;;  %v756_v39 = vld [vmem:[#allocation4 + $0x70] sm:$0xff]  }
  0x44   :  { %671 = vmatprep.subr.bf16.mxu1 %v756_v39 }
  0x46   :  { %398 = vmatpush1.bf16.msra.mxu0 %v719_v25 }
  0x47   :  { %399 = vmatprep.subr.bf16.mxu0 %v720_v26 }
  0x4a   :  { %400 = vmatpush1.bf16.msra.mxu0 %v722_v29  ;;  %v166_v29 = vrot.slane %v161_v22, %v885_v51 }
  0x4b   :  { %401 = vmatprep.subr.bf16.mxu0 %v723_v30  ;;  %v170_v30 = vrot.slane %v161_v22, %v887_v53 }
  0x4e   :  { %402 = vmatpush1.bf16.msra.mxu0 %v725_v31 }
  0x4f   :  { %403 = vmatprep.subr.bf16.mxu0 %v726_v34 }
  0x52   :  { %404 = vmatpush1.bf16.msra.mxu0 %v728_v37 }
  0x53   :  { %405 = vmatprep.subr.bf16.mxu0 %v729_v38 }
  0x56   :  { %406 = vmatpush1.bf16.msra.mxu0 %v731_v40  ;;  %v757_v40 = vld [vmem:[#allocation4 + $0x30] sm:$0xff]  }
  0x57   :  { %407 = vmatprep.subr.bf16.mxu0 %v732_v41  ;;  %672 = vmatpush3.bf16.msra.mxu1 %v757_v40  ;;  %v758_v41 = vld [vmem:[#allocation4 + $0x78] sm:$0xff]  }
  0x58   :  { %673 = vmatprep.subr.bf16.mxu1 %v758_v41 }
  0x5a   :  { %408 = vmatpush1.bf16.msra.mxu0 %v734_v42  ;;  %v759_v42 = vld [vmem:[#allocation4 + $0x38] sm:$0xff]  }
  0x5b   :  { %409 = vmatprep.subr.bf16.mxu0 %v735_v43  ;;  %674 = vmatpush3.bf16.msra.mxu1 %v759_v42  ;;  %v211_v43 = vld [vmem:[%s918_s4] sm:$0x3] }
  0x5e   :  { %410 = vmatpush1.bf16.msra.mxu0 %v737_v44  ;;  %v216_v44 = vrot.slane %v211_v43, %v885_v51 }
  0x5f   :  { %411 = vmatprep.subr.bf16.mxu0 %v738_v45  ;;  %v220_v45 = vrot.slane %v211_v43, %v887_v53 }
  0x62   :  { %412 = vmatpush1.bf16.msra.mxu0 %v740_v46 }
  0x63   :  { %413 = vmatprep.subr.bf16.mxu0 %v741_v47 }
  0x66   :  { %414 = vmatpush1.bf16.msra.mxu0 %v743_v48 }
  0xa7   :  { %v60_v2 = vpop.permute.xlu0 %59  ;;  %v111_v3 = vpop.permute.xlu1 %110 }
  0xa8   :  { %v81_v16 = vmul.f32 %v76_v6, %v60_v2  ;;  %v82_v17 = vmul.f32 %v80_v7, %v60_v2  ;;  %v131_v20 = vmul.f32 %v126_v10, %v111_v3  ;;  %v132_v21 = vmul.f32 %v130_v11, %v111_v3 }
  0xac   :  { %v85_v14 = vpop.permute.xlu0 %84  ;;  %v137_v15 = vpop.permute.xlu1 %136 }
  0xad   :  { %v105_v18 = vmul.f32 %v100_v8, %v85_v14  ;;  %v106_v19 = vmul.f32 %v104_v9, %v85_v14  ;;  %v157_v25 = vmul.f32 %v152_v12, %v137_v15  ;;  %v158_v26 = vmul.f32 %v156_v13, %v137_v15 }
  0xaf   :  { %v107_v23 = vadd.f32 %v105_v18, %v81_v16  ;;  %v108_v24 = vadd.f32 %v106_v19, %v82_v17 }
  0xb1   :  { %v133_v27 = vadd.f32 %v131_v20, %v107_v23  ;;  %v134_v28 = vadd.f32 %v132_v21, %v108_v24 }
  0xb3   :  { %v159_v31 = vadd.f32 %v157_v25, %v133_v27  ;;  %v160_v32 = vadd.f32 %v158_v26, %v134_v28 }
  0xb5   :  { %v174_v33 = vadd.f32 %v170_v30, %v160_v32  ;;  %v173_v34 = vadd.f32 %v166_v29, %v159_v31 }
  0xb7   :  { %v176_v35 = vmax.f32 %v174_v33, 0.0  ;;  %v175_v36 = vmax.f32 %v173_v34, 0.0 }
  0xb9   :  { %v178_v37 = vpack.c.bf16 %v176_v35, %v176_v35  ;;  %v177_v38 = vpack.c.bf16 %v175_v36, %v175_v36 }
  0xbb   :  { %415 = vmatprep.mubr.bf16.mxu0 %v178_v37 }
  0xbc   :  { %416 = vmatmul.mubr.bf16.vlgmr.msra.gmra.mrb[0].mxu0 %v177_v38 }
 0x18f   :  { %v417_v46 = vpop.f32.mrb[0].mxu0 }
 0x190   :  { %v418_v47 = vadd.f32 %v417_v46, %v216_v44  ;;  %v419_v48 = vpop.f32.mrb[1].mxu0 }
 0x191   :  { %v420_v49 = vadd.f32 %v419_v48, %v220_v45  ;;  %v421_v50 = vpop.f32.mrb[2].mxu0 }
 0x192   :  { %v424_v52 = vmax.f32 %v418_v47, 0.0  ;;  %v422_v54 = vpop.f32.mrb[3].mxu0 }
 0x193   :  { %v425_v55 = vmax.f32 %v420_v49, 0.0 }
 0x194   :  { %v426_v57 = vpack.c.bf16 %v424_v52, %v424_v52 }
 0x195   :  { %v427_v56 = vpack.c.bf16 %v425_v55, %v425_v55 }
 0x197   :  { %595 = vmatprep.mubr.bf16.mxu1 %v427_v56 }
 0x198   :  { %596 = vmatmul.mubr.bf16.vlgmr.msra.gmra.mrb[0].mxu1 %v426_v57 }
 0x26b   :  { %v675_v58 = vpop.f32.mrb[0].mxu1 }
 0x26c   :  { %v676_v51 = vpop.f32.mrb[1].mxu1 }
 0x26d   :  { %v677_v60 = vadd.f32 %v676_v51, %v675_v58  ;;  %v678_v53 = vpop.f32.mrb[2].mxu1 }
 0x26e   :  { %v679_v61 = vpop.f32.mrb[3].mxu1 }
 0x26f   :  { %v598_v62 = vadd.f32 %v677_v60, %v642_v59 }
 0x271   :  { %603 = vst [vmem:[%s921_s7] sm:$0xff] %v598_v62 }
 0x272   :  { %608 = vsyncpa [#allocation3], 1 }
 0x273   :  { %609 = vsyncpa [#allocation5], 1 }

</bundles_post_ra>
